<compile_context>
chip_gen: v7x
topology: tpu7x:2x2x1
jax: 0.10.0
libtpu: 0.0.40
codegen_flags: <defaults>
</compile_context>

<pallas_src>
import functools

import numpy as np
import jax
import jax.numpy as jnp
from jax.experimental import pallas as pl
from jax.experimental.pallas import tpu as pltpu


def _hann_window_np(win_length: int) -> np.ndarray:
    # torch.hann_window default is periodic: w[n] = 0.5*(1 - cos(2*pi*n/N))
    n = np.arange(win_length, dtype=np.float64)
    return 0.5 * (1.0 - np.cos(2.0 * np.pi * n / win_length))


def _windowed_irfft_basis_np(n_fft: int, window: np.ndarray) -> np.ndarray:
    """Real irfft (norm='backward') with the window folded in.

    frames[t] = window * irfft(X[t]) = [Re(X[t]) || Im(X[t])[1:-1]] @ basis,
    basis shape (n_fft, n_fft).  The Im rows of the DC and Nyquist bins are
    identically zero (sin == 0 there) and are dropped, so K == n_fft; this
    matches torch.fft.irfft, which ignores those imaginary parts anyway.
    """
    assert n_fft % 2 == 0
    nbins = n_fft // 2 + 1
    k = np.arange(nbins, dtype=np.float64)[:, None]            # (N, 1)
    n = np.arange(n_fft, dtype=np.float64)[None, :]            # (1, n_fft)
    ang = 2.0 * np.pi * k * n / n_fft                          # (N, n_fft)
    coeff = np.full((nbins, 1), 2.0 / n_fft)
    coeff[0, 0] = 1.0 / n_fft
    coeff[-1, 0] = 1.0 / n_fft                                 # Nyquist (even n_fft)
    cos_b = np.cos(ang) * coeff                                # (N, n_fft)
    sin_b = np.sin(ang) * coeff                                # (N, n_fft)
    basis = np.concatenate([cos_b, -sin_b[1:nbins - 1]], axis=0)   # (n_fft, n_fft)
    return basis * window[None, :]


def _istft_kernel(spec_ref, basis_ref, invenv_ref, out_ref, *, hop: int, n_taps: int):
    """One batch element per grid step.

    spec_ref   : (1, T, K)    [Re || Im(1:-1)] spectrogram, time-major, K == n_fft
    basis_ref  : (K, n_fft)   windowed irfft basis
    invenv_ref : (TB, hop)    1/window-envelope, hop-blocked (0 where env ~ 0)
    out_ref    : (1, TB, hop) hop-blocked, normalized, untrimmed signal
    """
    # irfft + windowing as ONE fused MXU matmul (f32 accumulation): (T, n_fft),
    # n_fft on the lane axis.
    frames = jnp.dot(spec_ref[0], basis_ref[...], preferred_element_type=jnp.float32)

    # Overlap-add in the value domain: out[m, j] = sum_r frames[m - r, r*hop + j].
    # Each term is the r-th hop-block of `frames` shifted down by r rows via
    # zero-padding; everything stays in vregs and out_ref is stored exactly once.
    acc = None
    for r in range(n_taps):
        blk = frames[:, r * hop:(r + 1) * hop]                 # (T, hop)
        parts = []
        if r > 0:
            parts.append(jnp.zeros((r, hop), jnp.float32))
        parts.append(blk)
        if n_taps - 1 - r > 0:
            parts.append(jnp.zeros((n_taps - 1 - r, hop), jnp.float32))
        term = parts[0] if len(parts) == 1 else jnp.concatenate(parts, axis=0)
        acc = term if acc is None else acc + term              # (TB, hop)

    out_ref[0] = (acc * invenv_ref[...]).astype(out_ref.dtype)


class ISTFTPallas:
    def __init__(self, n_fft: int, hop_length: int, win_length: int,
                 padding: str = "same", matmul_dtype=jnp.bfloat16):
        if padding not in ("center", "same"):
            raise ValueError("Padding must be 'center' or 'same'.")
        if padding == "center":
            # TODO(synk): padding='center' (delegates to torch.istft, center=True) not implemented.
            raise NotImplementedError("only padding='same' is implemented")
        if win_length != n_fft:
            raise NotImplementedError("this kernel assumes win_length == n_fft")
        if n_fft % 2 != 0:
            raise NotImplementedError("this kernel assumes even n_fft")
        if n_fft % hop_length != 0:
            # TODO(synk): general hop needs dynamic-offset lane scatter for the fold.
            raise NotImplementedError("this kernel assumes n_fft % hop_length == 0")
        self.padding = padding
        self.n_fft = n_fft
        self.hop_length = hop_length
        self.win_length = win_length
        self.matmul_dtype = matmul_dtype            # bf16 default (MXU-native), f32 optional
        self._n_taps = n_fft // hop_length

        self._window_np = _hann_window_np(win_length)                 # float64 host copy
        self.window = jnp.asarray(self._window_np, dtype=jnp.float32)
        # Window folded into the basis -> MXU produces windowed frames for free.
        self._basis = jnp.asarray(_windowed_irfft_basis_np(n_fft, self._window_np),
                                  dtype=matmul_dtype)                 # (n_fft, n_fft)

        self._env_cache = {}
        self._call_cache = {}
        self._buffered_ok = None    # probe pl.Buffered(1) support on first call

    # ------------------------------------------------------------------ glue
    def _inverse_envelope(self, T: int) -> jnp.ndarray:
        """(TB, hop) f32 inverse NOLA envelope; numpy on host, cached per T."""
        if T in self._env_cache:
            return self._env_cache[T]
        hop, win = self.hop_length, self.win_length
        pad = (win - hop) // 2
        output_size = (T - 1) * hop + win
        w2 = self._window_np ** 2
        env = np.zeros(output_size, dtype=np.float64)
        for t in range(T):
            env[t * hop:t * hop + win] += w2
        trimmed = env[pad:output_size - pad]
        assert (trimmed > 1e-11).all(), "NOLA check failed"    # host-side, no device sync
        inv = np.zeros_like(env)
        nz = env > 1e-11
        inv[nz] = 1.0 / env[nz]
        TB = T + self._n_taps - 1                              # output_size == TB * hop
        inv_blk = jnp.asarray(inv.reshape(TB, hop), dtype=jnp.float32)
        self._env_cache[T] = inv_blk
        return inv_blk

    def _vmem_limit_bytes(self, B, T, K, TB) -> int:
        it = jnp.dtype(self.matmul_dtype).itemsize
        n_fft, hop = self.n_fft, self.hop_length
        working = (
            2 * T * K * it            # spectrogram block (double-buffered)
            + 2 * K * n_fft * it      # basis (worst case if single-buffering is unavailable)
            + 2 * TB * hop * 4        # 1/envelope
            + 2 * TB * hop * 4        # output block (double-buffered)
            + 3 * T * n_fft * 4       # frames + value-domain OLA temporaries
        )
        # Floor at the common scoped default; cap well under every chip's physical VMEM.
        return int(min(100 * 2 ** 20, max(32 * 2 ** 20, int(working * 1.5))))

    def _build(self, B, T, K, TB, use_buffered: bool):
        n_fft, hop = self.n_fft, self.hop_length
        const_kw = {"pipeline_mode": pl.Buffered(1)} if use_buffered else {}
        kernel = functools.partial(_istft_kernel, hop=hop, n_taps=self._n_taps)
        it = jnp.dtype(self.matmul_dtype).itemsize
        cost = pl.CostEstimate(
            flops=2 * B * T * K * n_fft + B * self._n_taps * TB * hop,
            transcendentals=0,
            bytes_accessed=(B * T * K * it          # spectrogram
                            + K * n_fft * it        # basis (read once)
                            + 4 * TB * hop          # 1/envelope
                            + 4 * B * TB * hop),    # output
        )
        return pl.pallas_call(
            kernel,
            out_shape=jax.ShapeDtypeStruct((B, TB, hop), jnp.float32),
            grid_spec=pltpu.PrefetchScalarGridSpec(
                num_scalar_prefetch=0,
                grid=(B,),
                in_specs=[
                    pl.BlockSpec((1, T, K), lambda b: (b, 0, 0)),            # spectrogram
                    pl.BlockSpec((K, n_fft), lambda b: (0, 0), **const_kw),  # windowed basis
                    pl.BlockSpec((TB, hop), lambda b: (0, 0), **const_kw),   # 1 / envelope
                ],
                out_specs=pl.BlockSpec((1, TB, hop), lambda b: (b, 0, 0)),
            ),
            compiler_params=pltpu.CompilerParams(
                dimension_semantics=("parallel",),
                vmem_limit_bytes=self._vmem_limit_bytes(B, T, K, TB),
            ),
            cost_estimate=cost,
        )

    # --------------------------------------------------------------- forward
    def __call__(self, spec_re: jnp.ndarray, spec_im: jnp.ndarray) -> jnp.ndarray:
        assert spec_re.ndim == 3 and spec_im.shape == spec_re.shape
        B, N, T = spec_re.shape
        n_fft, hop, win = self.n_fft, self.hop_length, self.win_length
        assert N == n_fft // 2 + 1
        K = 2 * N - 2                                          # == n_fft
        pad = (win - hop) // 2
        output_size = (T - 1) * hop + win
        L = output_size - 2 * pad
        TB = T + self._n_taps - 1

        # Time-major [Re || Im(1:-1)] with K == n_fft; one fused XLA
        # transpose+concat+cast pass (bf16 write when matmul_dtype is bf16).
        # TODO(synk): accept the native (B, N, T) layout in-kernel to drop this pass.
        spec_cat = jnp.concatenate(
            [jnp.swapaxes(spec_re, 1, 2),
             jnp.swapaxes(spec_im[:, 1:N - 1, :], 1, 2)],
            axis=-1).astype(self.matmul_dtype)                 # (B, T, K)
        inv_env = self._inverse_envelope(T)                    # (TB, hop)

        out = None
        if self._buffered_ok is None:
            # Probe single-buffered constants (pl.Buffered(1)); fall back if rejected.
            try:
                fn = self._build(B, T, K, TB, use_buffered=True)
                out = jax.block_until_ready(fn(spec_cat, self._basis, inv_env))
                self._buffered_ok = True
                self._call_cache[(B, T)] = fn
            except Exception:
                self._buffered_ok = False
        if out is None:
            fn = self._call_cache.get((B, T))
            if fn is None:
                fn = self._build(B, T, K, TB, use_buffered=self._buffered_ok)
                self._call_cache[(B, T)] = fn
            out = fn(spec_cat, self._basis, inv_env)

        # hop-blocked -> flat, trim 'same' padding (pure layout work, done by XLA).
        return out.reshape(B, output_size)[:, pad:pad + L]


def istft_reference(spec_re, spec_im, window, n_fft, hop, win, pad):
    """Pure-JAX reference mirroring the PyTorch forward ('same' padding)."""
    spec = spec_re + 1j * spec_im
    ifft = jnp.fft.irfft(spec, n=n_fft, axis=1)                # (B, n_fft, T)
    ifft = ifft * window[None, :, None]
    B, _, T = ifft.shape
    out_size = (T - 1) * hop + win
    y = jnp.zeros((B, out_size), dtype=jnp.float32)
    env = jnp.zeros((out_size,), dtype=jnp.float32)
    for t in range(T):
        y = y.at[:, t * hop:t * hop + win].add(ifft[:, :, t])
        env = env.at[t * hop:t * hop + win].add(window ** 2)
    return y[:, pad:-pad] / env[pad:-pad][None, :]


if __name__ == "__main__":
    n_fft, hop_length, win_length = 16, 4, 16
    B, T = 2, 8
    N = n_fft // 2 + 1
    pad = (win_length - hop_length) // 2
    expected_len = (T - 1) * hop_length + win_length - 2 * pad

    key = jax.random.PRNGKey(0)
    k1, k2 = jax.random.split(key)
    spec_re = jax.random.normal(k1, (B, N, T), dtype=jnp.float32)
    spec_im = jax.random.normal(k2, (B, N, T), dtype=jnp.float32)
    # DC / Nyquist bins of a real signal's spectrum are purely real
    spec_im = spec_im.at[:, 0, :].set(0.0).at[:, N - 1, :].set(0.0)

    # Exact path (f32 MXU operands): tight check vs the pure-JAX reference.
    istft_f32 = ISTFTPallas(n_fft, hop_length, win_length, padding="same",
                            matmul_dtype=jnp.float32)
    y32 = istft_f32(spec_re, spec_im)
    jax.block_until_ready(y32)
    y_ref = istft_reference(spec_re, spec_im, istft_f32.window,
                            n_fft, hop_length, win_length, pad)
    assert y32.shape == (B, expected_len), y32.shape
    assert bool(jnp.allclose(y32, y_ref, rtol=1e-4, atol=1e-4)), "f32 mismatch vs reference"

    # Default path (bf16 MXU operands, f32 accumulation): loose check.
    istft_bf16 = ISTFTPallas(n_fft, hop_length, win_length, padding="same")
    y16 = istft_bf16(spec_re, spec_im)
    jax.block_until_ready(y16)
    assert y16.shape == (B, expected_len), y16.shape
    assert bool(jnp.allclose(y16, y_ref, rtol=3e-2, atol=3e-2)), "bf16 mismatch vs reference"

    print("KERNEL_OK")
</pallas_src>

<mosaic_0001>
module attributes {stable_mosaic.version = 11 : i64} {
  func.func @_istft_kernel(%arg0: i32, %arg1: memref<1x8x16xf32, #tpu.memory_space<vmem>>, %arg2: memref<16x16xf32, #tpu.memory_space<vmem>>, %arg3: memref<11x4xf32, #tpu.memory_space<vmem>>, %arg4: memref<1x11x4xf32, #tpu.memory_space<vmem>>) attributes {dimension_semantics = [#tpu.dimension_semantics<parallel>], iteration_bounds = array<i64: 2>, scalar_prefetch = 0 : i64, scratch_operands = 0 : i64, tpu.core_type = #tpu.core_type<tc>, window_params = [{transform_indices = @transform_0, window_bounds = array<i64: 1, 8, 16>}, {pipeline_mode = #tpu.pipeline_mode<synchronous>, transform_indices = @transform_1, window_bounds = array<i64: 16, 16>}, {pipeline_mode = #tpu.pipeline_mode<synchronous>, transform_indices = @transform_2, window_bounds = array<i64: 11, 4>}, {transform_indices = @transform_3, window_bounds = array<i64: 1, 11, 4>}]} {
    %c0 = arith.constant 0 : index
    %c0_0 = arith.constant 0 : index
    %c0_1 = arith.constant 0 : index
    %0 = vector.load %arg1[%c0, %c0_0, %c0_1] : memref<1x8x16xf32, #tpu.memory_space<vmem>>, vector<1x8x16xf32>
    %1 = vector.shape_cast %0 : vector<1x8x16xf32> to vector<8x16xf32>
    %c0_2 = arith.constant 0 : index
    %c0_3 = arith.constant 0 : index
    %2 = vector.load %arg2[%c0_2, %c0_3] : memref<16x16xf32, #tpu.memory_space<vmem>>, vector<16x16xf32>
    %cst = arith.constant dense<0.000000e+00> : vector<8x16xf32>
    %3 = tpu.matmul %1, %2, %cst {dimension_numbers = #tpu.dot_dimension_numbers<[1], [0], [0], [1], [0, 0, 1, 1], [], []>} : vector<8x16xf32>, vector<16x16xf32>, vector<8x16xf32> -> vector<8x16xf32>
    %4 = vector.extract_strided_slice %3 {offsets = [0, 0], sizes = [8, 4], strides = [1, 1]} : vector<8x16xf32> to vector<8x4xf32>
    %cst_4 = arith.constant 0.000000e+00 : f32
    %5 = vector.broadcast %cst_4 : f32 to vector<3x4xf32>
    %6 = tpu.concatenate %4, %5 in 0 : vector<8x4xf32>, vector<3x4xf32> -> vector<11x4xf32>
    %7 = vector.extract_strided_slice %3 {offsets = [0, 4], sizes = [8, 4], strides = [1, 1]} : vector<8x16xf32> to vector<8x4xf32>
    %cst_5 = arith.constant 0.000000e+00 : f32
    %8 = vector.broadcast %cst_5 : f32 to vector<1x4xf32>
    %cst_6 = arith.constant 0.000000e+00 : f32
    %9 = vector.broadcast %cst_6 : f32 to vector<2x4xf32>
    %10 = tpu.concatenate %8, %7, %9 in 0 : vector<1x4xf32>, vector<8x4xf32>, vector<2x4xf32> -> vector<11x4xf32>
    %11 = arith.addf %6, %10 : vector<11x4xf32>
    %12 = vector.extract_strided_slice %3 {offsets = [0, 8], sizes = [8, 4], strides = [1, 1]} : vector<8x16xf32> to vector<8x4xf32>
    %cst_7 = arith.constant 0.000000e+00 : f32
    %13 = vector.broadcast %cst_7 : f32 to vector<2x4xf32>
    %cst_8 = arith.constant 0.000000e+00 : f32
    %14 = vector.broadcast %cst_8 : f32 to vector<1x4xf32>
    %15 = tpu.concatenate %13, %12, %14 in 0 : vector<2x4xf32>, vector<8x4xf32>, vector<1x4xf32> -> vector<11x4xf32>
    %16 = arith.addf %11, %15 : vector<11x4xf32>
    %17 = vector.extract_strided_slice %3 {offsets = [0, 12], sizes = [8, 4], strides = [1, 1]} : vector<8x16xf32> to vector<8x4xf32>
    %cst_9 = arith.constant 0.000000e+00 : f32
    %18 = vector.broadcast %cst_9 : f32 to vector<3x4xf32>
    %19 = tpu.concatenate %18, %17 in 0 : vector<3x4xf32>, vector<8x4xf32> -> vector<11x4xf32>
    %20 = arith.addf %16, %19 : vector<11x4xf32>
    %c0_10 = arith.constant 0 : index
    %c0_11 = arith.constant 0 : index
    %21 = vector.load %arg3[%c0_10, %c0_11] : memref<11x4xf32, #tpu.memory_space<vmem>>, vector<11x4xf32>
    %22 = arith.mulf %20, %21 : vector<11x4xf32>
    %c0_12 = arith.constant 0 : index
    %c0_13 = arith.constant 0 : index
    %c0_14 = arith.constant 0 : index
    %23 = vector.load %arg4[%c0_12, %c0_13, %c0_14] : memref<1x11x4xf32, #tpu.memory_space<vmem>>, vector<1x11x4xf32>
    %24 = vector.shape_cast %23 : vector<1x11x4xf32> to vector<11x4xf32>
    %25 = vector.shape_cast %22 : vector<11x4xf32> to vector<1x11x4xf32>
    tpu.vector_store %arg4[%c0_12, %c0_13, %c0_14], %25 {strides = array<i32>} : memref<1x11x4xf32, #tpu.memory_space<vmem>>, vector<1x11x4xf32>,
    return
  }
  func.func @transform_0(%arg0: i32) -> (i32, i32, i32) {
    %c0_i32 = arith.constant 0 : i32
    %c0_i32_0 = arith.constant 0 : i32
    %c0_i32_1 = arith.constant 0 : i32
    return %arg0, %c0_i32, %c0_i32_0 : i32, i32, i32
  }
  func.func @transform_1(%arg0: i32) -> (i32, i32) {
    %c0_i32 = arith.constant 0 : i32
    %c0_i32_0 = arith.constant 0 : i32
    %c0_i32_1 = arith.constant 0 : i32
    return %c0_i32, %c0_i32_0 : i32, i32
  }
  func.func @transform_2(%arg0: i32) -> (i32, i32) {
    %c0_i32 = arith.constant 0 : i32
    %c0_i32_0 = arith.constant 0 : i32
    %c0_i32_1 = arith.constant 0 : i32
    return %c0_i32, %c0_i32_0 : i32, i32
  }
  func.func @transform_3(%arg0: i32) -> (i32, i32, i32) {
    %c0_i32 = arith.constant 0 : i32
    %c0_i32_0 = arith.constant 0 : i32
    %c0_i32_1 = arith.constant 0 : i32
    return %arg0, %c0_i32, %c0_i32_0 : i32, i32, i32
  }
}

module attributes {stable_mosaic.version = 11 : i64} {
  func.func @_istft_kernel(%arg0: i32, %arg1: memref<1x8x16xf32, #tpu.memory_space<vmem>>, %arg2: memref<16x16xf32, #tpu.memory_space<vmem>>, %arg3: memref<11x4xf32, #tpu.memory_space<vmem>>, %arg4: memref<1x11x4xf32, #tpu.memory_space<vmem>>) attributes {dimension_semantics = [#tpu.dimension_semantics<parallel>], iteration_bounds = array<i64: 2>, scalar_prefetch = 0 : i64, scratch_operands = 0 : i64, tpu.core_type = #tpu.core_type<tc>, window_params = [{transform_indices = @transform_0, window_bounds = array<i64: 1, 8, 16>}, {pipeline_mode = #tpu.pipeline_mode<synchronous>, transform_indices = @transform_1, window_bounds = array<i64: 16, 16>}, {pipeline_mode = #tpu.pipeline_mode<synchronous>, transform_indices = @transform_2, window_bounds = array<i64: 11, 4>}, {transform_indices = @transform_3, window_bounds = array<i64: 1, 11, 4>}]} {
    %c0 = arith.constant 0 : index
    %c0_0 = arith.constant 0 : index
    %c0_1 = arith.constant 0 : index
    %0 = vector.load %arg1[%c0, %c0_0, %c0_1] : memref<1x8x16xf32, #tpu.memory_space<vmem>>, vector<1x8x16xf32>
    %1 = vector.shape_cast %0 : vector<1x8x16xf32> to vector<8x16xf32>
    %c0_2 = arith.constant 0 : index
    %c0_3 = arith.constant 0 : index
    %2 = vector.load %arg2[%c0_2, %c0_3] : memref<16x16xf32, #tpu.memory_space<vmem>>, vector<16x16xf32>
    %cst = arith.constant dense<0.000000e+00> : vector<8x16xf32>
    %3 = tpu.matmul %1, %2, %cst {dimension_numbers = #tpu.dot_dimension_numbers<[1], [0], [0], [1], [0, 0, 1, 1], [], []>} : vector<8x16xf32>, vector<16x16xf32>, vector<8x16xf32> -> vector<8x16xf32>
    %4 = vector.extract_strided_slice %3 {offsets = [0, 0], sizes = [8, 4], strides = [1, 1]} : vector<8x16xf32> to vector<8x4xf32>
    %cst_4 = arith.constant 0.000000e+00 : f32
    %5 = vector.broadcast %cst_4 : f32 to vector<3x4xf32>
    %6 = tpu.concatenate %4, %5 in 0 : vector<8x4xf32>, vector<3x4xf32> -> vector<11x4xf32>
    %7 = vector.extract_strided_slice %3 {offsets = [0, 4], sizes = [8, 4], strides = [1, 1]} : vector<8x16xf32> to vector<8x4xf32>
    %cst_5 = arith.constant 0.000000e+00 : f32
    %8 = vector.broadcast %cst_5 : f32 to vector<1x4xf32>
    %cst_6 = arith.constant 0.000000e+00 : f32
    %9 = vector.broadcast %cst_6 : f32 to vector<2x4xf32>
    %10 = tpu.concatenate %8, %7, %9 in 0 : vector<1x4xf32>, vector<8x4xf32>, vector<2x4xf32> -> vector<11x4xf32>
    %11 = arith.addf %6, %10 : vector<11x4xf32>
    %12 = vector.extract_strided_slice %3 {offsets = [0, 8], sizes = [8, 4], strides = [1, 1]} : vector<8x16xf32> to vector<8x4xf32>
    %cst_7 = arith.constant 0.000000e+00 : f32
    %13 = vector.broadcast %cst_7 : f32 to vector<2x4xf32>
    %cst_8 = arith.constant 0.000000e+00 : f32
    %14 = vector.broadcast %cst_8 : f32 to vector<1x4xf32>
    %15 = tpu.concatenate %13, %12, %14 in 0 : vector<2x4xf32>, vector<8x4xf32>, vector<1x4xf32> -> vector<11x4xf32>
    %16 = arith.addf %11, %15 : vector<11x4xf32>
    %17 = vector.extract_strided_slice %3 {offsets = [0, 12], sizes = [8, 4], strides = [1, 1]} : vector<8x16xf32> to vector<8x4xf32>
    %cst_9 = arith.constant 0.000000e+00 : f32
    %18 = vector.broadcast %cst_9 : f32 to vector<3x4xf32>
    %19 = tpu.concatenate %18, %17 in 0 : vector<3x4xf32>, vector<8x4xf32> -> vector<11x4xf32>
    %20 = arith.addf %16, %19 : vector<11x4xf32>
    %c0_10 = arith.constant 0 : index
    %c0_11 = arith.constant 0 : index
    %21 = vector.load %arg3[%c0_10, %c0_11] : memref<11x4xf32, #tpu.memory_space<vmem>>, vector<11x4xf32>
    %22 = arith.mulf %20, %21 : vector<11x4xf32>
    %c0_12 = arith.constant 0 : index
    %c0_13 = arith.constant 0 : index
    %c0_14 = arith.constant 0 : index
    %23 = vector.load %arg4[%c0_12, %c0_13, %c0_14] : memref<1x11x4xf32, #tpu.memory_space<vmem>>, vector<1x11x4xf32>
    %24 = vector.shape_cast %23 : vector<1x11x4xf32> to vector<11x4xf32>
    %25 = vector.shape_cast %22 : vector<11x4xf32> to vector<1x11x4xf32>
    tpu.vector_store %arg4[%c0_12, %c0_13, %c0_14], %25 {strides = array<i32>} : memref<1x11x4xf32, #tpu.memory_space<vmem>>, vector<1x11x4xf32>,
    return
  }
  func.func @transform_0(%arg0: i32) -> (i32, i32, i32) {
    %c0_i32 = arith.constant 0 : i32
    %c0_i32_0 = arith.constant 0 : i32
    %c0_i32_1 = arith.constant 0 : i32
    return %arg0, %c0_i32, %c0_i32_0 : i32, i32, i32
  }
  func.func @transform_1(%arg0: i32) -> (i32, i32) {
    %c0_i32 = arith.constant 0 : i32
    %c0_i32_0 = arith.constant 0 : i32
    %c0_i32_1 = arith.constant 0 : i32
    return %c0_i32, %c0_i32_0 : i32, i32
  }
  func.func @transform_2(%arg0: i32) -> (i32, i32) {
    %c0_i32 = arith.constant 0 : i32
    %c0_i32_0 = arith.constant 0 : i32
    %c0_i32_1 = arith.constant 0 : i32
    return %c0_i32, %c0_i32_0 : i32, i32
  }
  func.func @transform_3(%arg0: i32) -> (i32, i32, i32) {
    %c0_i32 = arith.constant 0 : i32
    %c0_i32_0 = arith.constant 0 : i32
    %c0_i32_1 = arith.constant 0 : i32
    return %arg0, %c0_i32, %c0_i32_0 : i32, i32, i32
  }
}

</mosaic_0001>

<bundles_post_ra>
// kernel: tpu_custom_call.1
= control target key start
LH: loop header
LB: loop body
LE: loop exit
PB: predicated region body
PF: predicated region fallthrough
CT: control target
= control target key end

     0   :  { %8 = vsyncpa [#allocation3], 0  ;;  %s485_s12 = smov 0   ;;  %s551_s0 = inlined_call_operand.vmem [shape: f32[2,8,16], index: 0, kind: input, shape index: {}]   ;;  %s552_s1 = inlined_call_operand.hbm [shape: f32[16,16], index: 1, kind: input, shape index: {}]   ;;  %s553_s2 = inlined_call_operand.vmem [shape: f32[11,4], index: 2, kind: input, shape index: {}]   ;;  %s554_s3 = inlined_call_operand.vmem [shape: f32[2,11,4], index: 3, kind: output, shape index: {}]  }
   0x1 LB: > { %s491_s13 = sadd.s32 4294967295, %s454_s12   ;;  %p364_p0 = scmp.ge.s32.totalorder %s454_s12, 1  ;;  %s454_s12 = sphi %s485_s12, %s14_s12  }
   0x2   : > { %p113_p1 = scmp.lt.s32.totalorder %s454_s12, 3  ;;  %s456_s14 = smov [#allocation2]  }
   0x3   : > { %s125_s15 = sshll.u32 %s456_s14, 4  ;;  %p555_p3 = scmp.eq.s32.totalorder %s491_s13, 0  ;;  %s126_s15 = int_to_ptr.vmem [resolvable:$true] %s125_s15 }
   0x4   : > { %p495_p2 = pnand %p364_p0, %p113_p1  ;;  %s416_s20 = scalar_lea.hbm %s552_s1, 256 }
   0x5   : > { %p417_p6 = scmp.ne.s32.totalorder %s552_s1, %s416_s20  ;;  %p423_p10 = scmp.lt.u32.totalorder %s416_s20, %s552_s1 }
   0x6   : > { %s557_s16 = scalar_select %p495_p2, 1, 0 }
   0x7   : > { %p393_p4 = pneg %p495_p2 }
   0x9   : > { %p504_p5 = pnand %p555_p3, %p393_p4 }
   0xb   : > { %p418_p7 = pneg %p504_p5 }
   0xd   : > { %p419_p8 = pnand %p418_p7, %p417_p6 }
   0xf   : > { %p420_p9 = pneg %p419_p8 }
  0x11   : > { %p425_p11 = pnand %p423_p10, %p420_p9 }
  0x13   : > { %428 = shalt.err (!%p425_p11)
}
  0x14   : > { %s429_s25 = scalar_lea.vmem %s126_s15, 256  ;;  %p437_p1 = scmp.lt.s32.totalorder %s126_s15, %s126_s15 }
  0x15   : > { %p430_p12 = scmp.ne.s32.totalorder %s126_s15, %s429_s25  ;;  %p438_p4 = scmp.lt.s32.totalorder %s429_s25, %s429_s25 }
  0x17   : > { %p432_p13 = pnand %p430_p12, %p418_p7  ;;  %p439_p3 = por %p438_p4, %p437_p1 }
  0x19   : > { %p433_p0 = pneg %p432_p13 }
  0x1b   : > { %p440_p2 = pnand %p439_p3, %p433_p0 }
  0x1d   : > { %443 = shalt.err (!%p440_p2)
}
  0x1e   : > { %s457_s26 = smov 128   ;;  %s458_s27 = smov 8  }
  0x1f   : > { %396 = dma.hbm_to_vmem [thread:$0]  (!%p504_p5), %s552_s1, 256, %s126_s15, [#allocation3], %s457_s26, %s457_s26, %s458_s27  }
  0x20   : > { %p559_p6 = scmp.ne.s32.totalorder %s557_s16, 0 }
  0x21   : > { %p560_p8 = scmp.eq.s32.totalorder (!%p559_p6), %s491_s13, 0 }
  0x22   : > { %151 = sbr.rel (%p559_p6) target bundleno = 390 (0x186), region = 32 }
  0x29   : > { %449 = dma.done.wait (%p560_p8), [#allocation3], 256   ;;  %p561_p7 = pmov %p560_p8 }
  0x2a   : > { %p174_p2 = scmp.lt.s32.totalorder %s491_s13, 1  ;;  %v459_v0 = vmov 0.0|0.0   ;;  %vm460_vm0 = vmmov 0   ;;  %v461_v1 = vmov 0.0   ;;  %v184_v2 = vld [vmem:[#allocation2] sm:$0xff]  ;;  %v185_v3 = vld [vmem:[#allocation2 + $0x8] sm:$0xff] }
  0x2b   : > { %451 = vsyncadd (%p561_p7), [#allocation3], 4294967040  ;;  %386 = vmatprep.subr.bf16.mxu0 %v459_v0  ;;  %383 = vmatprep.mubr.msk.f32.mxu0 %vm460_vm0, %v461_v1  ;;  %v387_v4 = vpack.c.bf16 %v185_v3, %v184_v2  ;;  %vm186_vm1 = vcmask 130048   ;;  %s462_s7 = smov 116   ;;  %s463_s8 = smov 124   ;;  %vm265_vm2 = vcmask 1040384  }
  0x2c   : > { %s563_s13 = smov (!%p174_p2, %s491_s13), 1  ;;  %s464_s9 = smov 120   ;;  %vm274_vm3 = vcmask 1041408   ;;  %vm283_vm4 = vcmask 1042432   ;;  %v287_v22 = vld [vmem:[%s553_s2] sm:$0xff]  ;;  %vm291_vm5 = vcmask 31744  }
  0x2d   : > { %s369_s30 = sshll.u32 %s563_s13, 3  ;;  %388 = vmatpush3.bf16.msra.mxu0 %v387_v4  ;;  %s375_s10 = sshll.u32 %s563_s13, 4  ;;  %v288_v23 = vld [vmem:[%s553_s2 + $0x8] sm:$0x7]  ;;  %vm293_vm6 = vcmask 26624  }
  0x2e   : > { %s177_s6 = scalar_lea.vmem %s551_s0, %s369_s30  ;;  %s182_s19 = scalar_lea.vmem %s554_s3, %s375_s10 }
  0x2f   : > { %v183_v5 = vld [vmem:[%s177_s6] sm:$0xff] }
  0x30   : > { %384 = vmatmul.mubr.msk.f32.vlgmr.msra.gmra.mrb[0].mxu0 %vm186_vm1, %v183_v5 }
 0x103   : > { %v256_v6 = vpop.f32.mrb[0].mxu0 }
 0x104   : > { %v385_v7 = vpop.f32.mrb[1].mxu0  ;;  %v279_v8 = vrot.slane %v256_v6, 5  ;;  %v261_v9 = vrot.slane %v256_v6, 7  ;;  %v270_v10 = vrot.slane %v256_v6, 6 }
 0x106   : > { %280 = vrot.lane.b32.xlu1 %v279_v8, %s462_s7  ;;  %262 = vrot.lane.b32.xlu0 %v261_v9, %s463_s8 }
 0x10a   : > { %271 = vrot.lane.b32.xlu0 %v270_v10, %s464_s9 }
 0x178   : > { %v263_v11 = vpop.permute.xlu0 %262  ;;  %v281_v13 = vpop.permute.xlu1 %280 }
 0x179   : > { %v266_v12 = vsel %vm265_vm2, 0.0, %v263_v11  ;;  %v267_v16 = vsel %vm265_vm2, %v263_v11, 0.0  ;;  %v284_v21 = vsel %vm283_vm4, 0.0, %v281_v13 }
 0x17a   : > { %v268_v14 = vadd.f32 %v266_v12, %v256_v6 }
 0x17c   : > { %v272_v15 = vpop.permute.xlu0 %271 }
 0x17d   : > { %v275_v17 = vsel %vm274_vm3, 0.0, %v272_v15  ;;  %v276_v18 = vsel %vm274_vm3, %v272_v15, 0.0 }
 0x17e   : > { %v277_v19 = vadd.f32 %v275_v17, %v268_v14  ;;  %v278_v20 = vadd.f32 %v276_v18, %v267_v16 }
 0x180   : > { %v285_v24 = vadd.f32 %v284_v21, %v277_v19  ;;  %v286_v25 = vadd.f32 %v281_v13, %v278_v20 }
 0x182   : > { %v289_v26 = vmul.f32 %v287_v22, %v285_v24  ;;  %v290_v27 = vmul.f32 %v288_v23, %v286_v25 }
 0x184   : > { %292 = vst.msk [vmem:[%s182_s19] sm:$0xff] %vm291_vm5, %v289_v26 }
 0x185   : > { %294 = vst.msk [vmem:[%s182_s19 + $0x8] sm:$0x7] %vm293_vm6, %v290_v27 }
 0x186 PF: > { %s14_s12 = sadd.s32 1, %s454_s12  }
 0x187   : > { %p11_p3 = scmp.ge.s32.totalorder %s14_s12, 4  }
 0x189   :  { %13 = sbr.rel (!%p11_p3) target bundleno = 1 (0x1), region = 67 }
 0x190   :  { %316 = vsyncpa [#allocation3], 1 }
 0x191   :  { %318 = vsyncpa [#allocation3 + $0x1], 1 }

// kernel: tpu_custom_call.1
= control target key start
LH: loop header
LB: loop body
LE: loop exit
PB: predicated region body
PF: predicated region fallthrough
CT: control target
= control target key end

     0   :  { %8 = vsyncpa [#allocation3], 0  ;;  %s485_s12 = smov 0   ;;  %s551_s0 = inlined_call_operand.vmem [shape: f32[2,8,16], index: 0, kind: input, shape index: {}]   ;;  %s552_s1 = inlined_call_operand.hbm [shape: f32[16,16], index: 1, kind: input, shape index: {}]   ;;  %s553_s2 = inlined_call_operand.vmem [shape: f32[11,4], index: 2, kind: input, shape index: {}]   ;;  %s554_s3 = inlined_call_operand.vmem [shape: f32[2,11,4], index: 3, kind: output, shape index: {}]  }
   0x1 LB: > { %s491_s13 = sadd.s32 4294967295, %s454_s12   ;;  %p364_p0 = scmp.ge.s32.totalorder %s454_s12, 1  ;;  %s454_s12 = sphi %s485_s12, %s14_s12  }
   0x2   : > { %p113_p1 = scmp.lt.s32.totalorder %s454_s12, 3  ;;  %s456_s14 = smov [#allocation2]  }
   0x3   : > { %s125_s15 = sshll.u32 %s456_s14, 4  ;;  %p555_p3 = scmp.eq.s32.totalorder %s491_s13, 0  ;;  %s126_s15 = int_to_ptr.vmem [resolvable:$true] %s125_s15 }
   0x4   : > { %p495_p2 = pnand %p364_p0, %p113_p1  ;;  %s416_s20 = scalar_lea.hbm %s552_s1, 256 }
   0x5   : > { %p417_p6 = scmp.ne.s32.totalorder %s552_s1, %s416_s20  ;;  %p423_p10 = scmp.lt.u32.totalorder %s416_s20, %s552_s1 }
   0x6   : > { %s557_s16 = scalar_select %p495_p2, 1, 0 }
   0x7   : > { %p393_p4 = pneg %p495_p2 }
   0x9   : > { %p504_p5 = pnand %p555_p3, %p393_p4 }
   0xb   : > { %p418_p7 = pneg %p504_p5 }
   0xd   : > { %p419_p8 = pnand %p418_p7, %p417_p6 }
   0xf   : > { %p420_p9 = pneg %p419_p8 }
  0x11   : > { %p425_p11 = pnand %p423_p10, %p420_p9 }
  0x13   : > { %428 = shalt.err (!%p425_p11)
}
  0x14   : > { %s429_s25 = scalar_lea.vmem %s126_s15, 256  ;;  %p437_p1 = scmp.lt.s32.totalorder %s126_s15, %s126_s15 }
  0x15   : > { %p430_p12 = scmp.ne.s32.totalorder %s126_s15, %s429_s25  ;;  %p438_p4 = scmp.lt.s32.totalorder %s429_s25, %s429_s25 }
  0x17   : > { %p432_p13 = pnand %p430_p12, %p418_p7  ;;  %p439_p3 = por %p438_p4, %p437_p1 }
  0x19   : > { %p433_p0 = pneg %p432_p13 }
  0x1b   : > { %p440_p2 = pnand %p439_p3, %p433_p0 }
  0x1d   : > { %443 = shalt.err (!%p440_p2)
}
  0x1e   : > { %s457_s26 = smov 128   ;;  %s458_s27 = smov 8  }
  0x1f   : > { %396 = dma.hbm_to_vmem [thread:$0]  (!%p504_p5), %s552_s1, 256, %s126_s15, [#allocation3], %s457_s26, %s457_s26, %s458_s27  }
  0x20   : > { %p559_p6 = scmp.ne.s32.totalorder %s557_s16, 0 }
  0x21   : > { %p560_p8 = scmp.eq.s32.totalorder (!%p559_p6), %s491_s13, 0 }
  0x22   : > { %151 = sbr.rel (%p559_p6) target bundleno = 390 (0x186), region = 32 }
  0x29   : > { %449 = dma.done.wait (%p560_p8), [#allocation3], 256   ;;  %p561_p7 = pmov %p560_p8 }
  0x2a   : > { %p174_p2 = scmp.lt.s32.totalorder %s491_s13, 1  ;;  %v459_v0 = vmov 0.0|0.0   ;;  %vm460_vm0 = vmmov 0   ;;  %v461_v1 = vmov 0.0   ;;  %v184_v2 = vld [vmem:[#allocation2] sm:$0xff]  ;;  %v185_v3 = vld [vmem:[#allocation2 + $0x8] sm:$0xff] }
  0x2b   : > { %451 = vsyncadd (%p561_p7), [#allocation3], 4294967040  ;;  %386 = vmatprep.subr.bf16.mxu0 %v459_v0  ;;  %383 = vmatprep.mubr.msk.f32.mxu0 %vm460_vm0, %v461_v1  ;;  %v387_v4 = vpack.c.bf16 %v185_v3, %v184_v2  ;;  %vm186_vm1 = vcmask 130048   ;;  %s462_s7 = smov 116   ;;  %s463_s8 = smov 124   ;;  %vm265_vm2 = vcmask 1040384  }
  0x2c   : > { %s563_s13 = smov (!%p174_p2, %s491_s13), 1  ;;  %s464_s9 = smov 120   ;;  %vm274_vm3 = vcmask 1041408   ;;  %vm283_vm4 = vcmask 1042432   ;;  %v287_v22 = vld [vmem:[%s553_s2] sm:$0xff]  ;;  %vm291_vm5 = vcmask 31744  }
  0x2d   : > { %s369_s30 = sshll.u32 %s563_s13, 3  ;;  %388 = vmatpush3.bf16.msra.mxu0 %v387_v4  ;;  %s375_s10 = sshll.u32 %s563_s13, 4  ;;  %v288_v23 = vld [vmem:[%s553_s2 + $0x8] sm:$0x7]  ;;  %vm293_vm6 = vcmask 26624  }
  0x2e   : > { %s177_s6 = scalar_lea.vmem %s551_s0, %s369_s30  ;;  %s182_s19 = scalar_lea.vmem %s554_s3, %s375_s10 }
  0x2f   : > { %v183_v5 = vld [vmem:[%s177_s6] sm:$0xff] }
  0x30   : > { %384 = vmatmul.mubr.msk.f32.vlgmr.msra.gmra.mrb[0].mxu0 %vm186_vm1, %v183_v5 }
 0x103   : > { %v256_v6 = vpop.f32.mrb[0].mxu0 }
 0x104   : > { %v385_v7 = vpop.f32.mrb[1].mxu0  ;;  %v279_v8 = vrot.slane %v256_v6, 5  ;;  %v261_v9 = vrot.slane %v256_v6, 7  ;;  %v270_v10 = vrot.slane %v256_v6, 6 }
 0x106   : > { %280 = vrot.lane.b32.xlu1 %v279_v8, %s462_s7  ;;  %262 = vrot.lane.b32.xlu0 %v261_v9, %s463_s8 }
 0x10a   : > { %271 = vrot.lane.b32.xlu0 %v270_v10, %s464_s9 }
 0x178   : > { %v263_v11 = vpop.permute.xlu0 %262  ;;  %v281_v13 = vpop.permute.xlu1 %280 }
 0x179   : > { %v266_v12 = vsel %vm265_vm2, 0.0, %v263_v11  ;;  %v267_v16 = vsel %vm265_vm2, %v263_v11, 0.0  ;;  %v284_v21 = vsel %vm283_vm4, 0.0, %v281_v13 }
 0x17a   : > { %v268_v14 = vadd.f32 %v266_v12, %v256_v6 }
 0x17c   : > { %v272_v15 = vpop.permute.xlu0 %271 }
 0x17d   : > { %v275_v17 = vsel %vm274_vm3, 0.0, %v272_v15  ;;  %v276_v18 = vsel %vm274_vm3, %v272_v15, 0.0 }
 0x17e   : > { %v277_v19 = vadd.f32 %v275_v17, %v268_v14  ;;  %v278_v20 = vadd.f32 %v276_v18, %v267_v16 }
 0x180   : > { %v285_v24 = vadd.f32 %v284_v21, %v277_v19  ;;  %v286_v25 = vadd.f32 %v281_v13, %v278_v20 }
 0x182   : > { %v289_v26 = vmul.f32 %v287_v22, %v285_v24  ;;  %v290_v27 = vmul.f32 %v288_v23, %v286_v25 }
 0x184   : > { %292 = vst.msk [vmem:[%s182_s19] sm:$0xff] %vm291_vm5, %v289_v26 }
 0x185   : > { %294 = vst.msk [vmem:[%s182_s19 + $0x8] sm:$0x7] %vm293_vm6, %v290_v27 }
 0x186 PF: > { %s14_s12 = sadd.s32 1, %s454_s12  }
 0x187   : > { %p11_p3 = scmp.ge.s32.totalorder %s14_s12, 4  }
 0x189   :  { %13 = sbr.rel (!%p11_p3) target bundleno = 1 (0x1), region = 67 }
 0x190   :  { %316 = vsyncpa [#allocation3], 1 }
 0x191   :  { %318 = vsyncpa [#allocation3 + $0x1], 1 }

</bundles_post_ra>
